<compile_context>
chip_gen: v7x
topology: tpu7x:2x2x1
jax: 0.10.0
libtpu: 0.0.40
codegen_flags: <defaults>
</compile_context>

<pallas_src>
import functools

import jax
import jax.numpy as jnp
import numpy as np
from jax import lax
from jax.experimental import pallas as pl
from jax.experimental.pallas import tpu as pltpu

BN_EPS = 1e-5
_MIB = 1024 * 1024


# --------------------------------------------------------------------------- #
# helpers
# --------------------------------------------------------------------------- #

def _vmem_capacity_bytes():
    """Physical VMEM per TensorCore; conservative 64 MiB (v7x-sized) fallback."""
    try:
        return int(pltpu.get_tpu_info().vmem_capacity_bytes)
    except Exception:
        return 64 * _MIB


def _round_up(x, m):
    return (x + m - 1) // m * m


def _buf_bytes(shape, itemsize):
    """VMEM footprint of a buffer including (sublane, lane) layout padding."""
    sub = 8 * max(4 // itemsize, 1)          # 8 rows f32 / 16 bf16 / 32 int8
    dims = list(shape)
    dims[-1] = _round_up(dims[-1], 128)
    if len(dims) >= 2:
        dims[-2] = _round_up(dims[-2], sub)
    n = 1
    for d in dims:
        n *= d
    return n * itemsize


def _divisor_tiles(n, unit):
    """Divisors d of n (descending) with d == n or d % unit == 0."""
    cands = [n]
    for d in range(n - 1, 0, -1):
        if n % d == 0 and d % unit == 0:
            cands.append(d)
    return cands


def _choose_bc_tiles(B, C, HW, itemsize, per_tile_budget):
    """Largest (bt, ct) with bt | B and ct | C (ct a multiple of 8 or the full
    C) whose (bt, ct, HW) block plus its (bt, ct, 1) companion fits the
    per-tile budget.  The spatial axis is never tiled, so x never needs
    padding or an extra HBM copy."""
    b_cands = _divisor_tiles(B, 1)
    c_cands = _divisor_tiles(C, 8)

    def tile_bytes(bt, ct):
        return (_buf_bytes((bt, ct, HW), itemsize)
                + _buf_bytes((bt, ct, 1), 4))

    best, best_elems = (b_cands[-1], c_cands[-1]), -1
    for bt in b_cands:
        for ct in c_cands:
            if tile_bytes(bt, ct) <= per_tile_budget and bt * ct > best_elems:
                best, best_elems = (bt, ct), bt * ct
    return best


def _gate_math(y, w1, w2, gamma, beta):
    """fc1 -> ReLU -> fc2 -> BatchNorm1d (training-mode stats) -> sigmoid.

    O(B*C*C_red) work; in the two-pass path it runs as plain JAX in the wrapper
    so the bandwidth-bound Pallas passes stay fully 'parallel' (both v7x TCs).
    """
    h = jnp.maximum(y @ w1.T, 0.0)
    z = h @ w2.T
    mu = jnp.mean(z, axis=0, keepdims=True)
    var = jnp.mean((z - mu) ** 2, axis=0, keepdims=True)
    zn = (z - mu) * lax.rsqrt(var + BN_EPS)
    zn = zn * gamma[None, :] + beta[None, :]
    return jax.nn.sigmoid(zn)


# --------------------------------------------------------------------------- #
# kernels
# --------------------------------------------------------------------------- #

def _fused_kernel(x_ref, w1t_ref, w2t_ref, gamma_ref, beta_ref, o_ref,
                  xc_ref, sum_ref, gate_ref, *, inv_hw, bt, ct, n_bt, n_ct):
    """Fused path: pool + cache (phase 0), gate + rescale from VMEM (phase 1)."""
    p = pl.program_id(0)
    b = pl.program_id(1)
    c = pl.program_id(2)
    # Static full slices when an axis is untiled; otherwise aligned pl.ds
    # (ct is a multiple of 8 whenever n_ct > 1, so sublane starts are aligned).
    rb = slice(None) if n_bt == 1 else pl.ds(pl.multiple_of(b * bt, bt), bt)
    rc = slice(None) if n_ct == 1 else pl.ds(pl.multiple_of(c * ct, ct), ct)

    @pl.when(p == 0)
    def _pool_and_cache():
        xt = x_ref[...]                                        # (bt, ct, HW)
        xc_ref[rb, rc, :] = xt                                 # VMEM cache of x
        sum_ref[rb, rc, :] = jnp.sum(xt.astype(jnp.float32), axis=-1,
                                     keepdims=True)

    @pl.when(p == 1)
    def _gate_and_rescale():
        @pl.when(jnp.logical_and(b == 0, c == 0))
        def _make_gate():
            y = sum_ref[...][:, :, 0] * inv_hw                 # (B, C) mean
            h = jnp.maximum(jnp.dot(y, w1t_ref[...],
                                    preferred_element_type=jnp.float32), 0.0)
            z = jnp.dot(h, w2t_ref[...], preferred_element_type=jnp.float32)
            mu = jnp.mean(z, axis=0, keepdims=True)            # training-mode BN
            var = jnp.mean((z - mu) ** 2, axis=0, keepdims=True)
            zn = (z - mu) * lax.rsqrt(var + BN_EPS)
            zn = zn * gamma_ref[...] + beta_ref[...]
            g = jax.nn.sigmoid(zn)                             # (B, C)
            # Store as (B, C, 1): C on sublanes -> lane broadcast is a splat.
            gate_ref[...] = g[:, :, None].astype(gate_ref.dtype)

        xt = xc_ref[rb, rc, :]                                 # cached tile
        g = gate_ref[rb, rc, :]                                # (bt, ct, 1)
        o_ref[...] = (xt * g).astype(o_ref.dtype)


def _pool_kernel(x_ref, sum_ref):
    """Two-pass fallback, pass 1: spatial sum of one (bt, ct, HW) block."""
    sum_ref[...] = jnp.sum(x_ref[...].astype(jnp.float32), axis=-1,
                           keepdims=True)


def _rescale_kernel(gate_ref, x_ref, o_ref):
    """Two-pass fallback, pass 2: x * gate.  Gate arrives as (bt, ct, 1) in the
    multiply dtype (native bf16/f16 multiply; lane broadcast is a splat)."""
    o_ref[...] = (x_ref[...] * gate_ref[...]).astype(o_ref.dtype)


# --------------------------------------------------------------------------- #
# wrapper
# --------------------------------------------------------------------------- #

def baa_block(x_nchw, w1, w2, gamma, beta, *, force_two_pass=False):
    """Forward pass of BAABlock.

    x_nchw: (B, C, H, W). w1: (C//r, C) fc1.weight, w2: (C, C//r) fc2.weight,
    gamma/beta: (C,) BatchNorm1d affine params.  Returns same shape & dtype.
    """
    B, C, H, W = x_nchw.shape
    HW = H * W
    dtype = x_nchw.dtype
    itemsize = np.dtype(dtype).itemsize
    C_red = w1.shape[0]
    inv_hw = 1.0 / HW

    x3 = x_nchw.reshape(B, C, HW)          # free reshape, native-dtype I/O

    # Gate dtype for the rescale multiply: native low-precision multiply for
    # 16-bit floats (gate is a sigmoid in [0, 1]; on v5e Mosaic just widens).
    if itemsize == 2 and jnp.issubdtype(dtype, jnp.floating):
        gate_dtype = dtype
    else:
        gate_dtype = jnp.float32
    gate_isz = np.dtype(gate_dtype).itemsize

    w1f = jnp.asarray(w1, jnp.float32)
    w2f = jnp.asarray(w2, jnp.float32)
    gamma_f = jnp.asarray(gamma, jnp.float32).reshape(C)
    beta_f = jnp.asarray(beta, jnp.float32).reshape(C)

    vmem_cap = _vmem_capacity_bytes()
    x_hbm_bytes = B * C * HW * itemsize
    gate_flops = 4 * B * C * C_red + 10 * B * C

    # ------------------ fused fast path: cache x in VMEM ------------------ #
    cache_b = _buf_bytes((B, C, HW), itemsize)
    resident_b = (2 * (_buf_bytes((C, C_red), 4) + _buf_bytes((C_red, C), 4)
                       + 2 * _buf_bytes((1, C), 4))
                  + _buf_bytes((B, C, 1), 4) + _buf_bytes((B, C, 1), gate_isz)
                  + 2 * _MIB)
    fused_budget = (vmem_cap * 7) // 10
    avail = fused_budget - cache_b - resident_b
    use_fused = (not force_two_pass) and avail > 0
    if use_fused:
        bt, ct = _choose_bc_tiles(B, C, HW, itemsize, max(avail // 4, 1))
        pipe_b = 4 * _buf_bytes((bt, ct, HW), itemsize)   # 2 in + 2 out buffers
        use_fused = cache_b + resident_b + pipe_b <= fused_budget

    if use_fused:
        n_bt, n_ct = B // bt, C // ct
        vmem_limit = int(min(vmem_cap,
                             max(cache_b + resident_b + pipe_b + 8 * _MIB,
                                 32 * _MIB)))

        def x_map(p, b, c):
            # phase 0: walk all (b, c) tiles; phase 1: park on the last tile so
            # no x block is re-fetched from HBM while rescaling from the cache.
            return (b + p * (n_bt - 1 - b), c + p * (n_ct - 1 - c), 0)

        def o_map(p, b, c):
            # phase 0: constant block index (never flushed before it is fully
            # overwritten at the first phase-1 step); phase 1: one block/step.
            return (b * p, c * p, 0)

        def _const(shape):
            return pl.BlockSpec(shape, lambda p, b, c: (0,) * len(shape))

        out3 = pl.pallas_call(
            functools.partial(_fused_kernel, inv_hw=inv_hw,
                              bt=bt, ct=ct, n_bt=n_bt, n_ct=n_ct),
            out_shape=jax.ShapeDtypeStruct((B, C, HW), dtype),
            grid=(2, n_bt, n_ct),
            in_specs=[
                pl.BlockSpec((bt, ct, HW), x_map),
                _const((C, C_red)),                     # fc1.weight^T (resident)
                _const((C_red, C)),                     # fc2.weight^T (resident)
                _const((1, C)),                         # bn.weight
                _const((1, C)),                         # bn.bias
            ],
            out_specs=pl.BlockSpec((bt, ct, HW), o_map),
            scratch_shapes=[
                pltpu.VMEM((B, C, HW), dtype),          # x cache
                pltpu.VMEM((B, C, 1), jnp.float32),     # pooled spatial sums
                pltpu.VMEM((B, C, 1), gate_dtype),      # sigmoid gate
            ],
            compiler_params=pltpu.CompilerParams(
                dimension_semantics=("arbitrary", "arbitrary", "arbitrary"),
                vmem_limit_bytes=vmem_limit),
            cost_estimate=pl.CostEstimate(
                flops=2 * B * C * HW + gate_flops,
                transcendentals=2 * B * C,
                bytes_accessed=2 * x_hbm_bytes),
        )(x3, w1f.T, w2f.T, gamma_f.reshape(1, C), beta_f.reshape(1, C))
        return out3.reshape(B, C, H, W)

    # --------------- two-pass fallback: x does not fit VMEM --------------- #
    pipeline_budget = max(vmem_cap // 4, 8 * _MIB)

    # Pass 1 (pool): only the x input is double-buffered -> larger tiles.
    bt1, ct1 = _choose_bc_tiles(B, C, HW, itemsize, pipeline_budget // 2)
    live1 = (2 * _buf_bytes((bt1, ct1, HW), itemsize)
             + 2 * _buf_bytes((bt1, ct1, 1), 4))
    limit1 = int(min(vmem_cap, max(live1 + 8 * _MIB, 32 * _MIB)))
    sums = pl.pallas_call(
        _pool_kernel,
        out_shape=jax.ShapeDtypeStruct((B, C, 1), jnp.float32),
        grid=(B // bt1, C // ct1),
        in_specs=[pl.BlockSpec((bt1, ct1, HW), lambda b, c: (b, c, 0))],
        out_specs=pl.BlockSpec((bt1, ct1, 1), lambda b, c: (b, c, 0)),
        compiler_params=pltpu.CompilerParams(
            dimension_semantics=("parallel", "parallel"),
            vmem_limit_bytes=limit1),
        cost_estimate=pl.CostEstimate(flops=B * C * HW, transcendentals=0,
                                      bytes_accessed=x_hbm_bytes + 4 * B * C),
    )(x3)

    # Tiny O(B*C) gate math as plain JAX (keeps the Pallas grids fully
    # 'parallel' so v7x shards both bandwidth-bound passes across its 2 TCs).
    y = sums[:, :, 0] * inv_hw
    gate3 = _gate_math(y, w1f, w2f, gamma_f, beta_f)[:, :, None].astype(gate_dtype)

    # Pass 2 (rescale): 2 in + 2 out + 2 gate buffers live.
    bt2, ct2 = _choose_bc_tiles(B, C, HW, itemsize, pipeline_budget // 5)
    live2 = (4 * _buf_bytes((bt2, ct2, HW), itemsize)
             + 2 * _buf_bytes((bt2, ct2, 1), gate_isz))
    limit2 = int(min(vmem_cap, max(live2 + 8 * _MIB, 32 * _MIB)))
    out3 = pl.pallas_call(
        _rescale_kernel,
        out_shape=jax.ShapeDtypeStruct((B, C, HW), dtype),
        grid=(B // bt2, C // ct2),
        in_specs=[pl.BlockSpec((bt2, ct2, 1), lambda b, c: (b, c, 0)),
                  pl.BlockSpec((bt2, ct2, HW), lambda b, c: (b, c, 0))],
        out_specs=pl.BlockSpec((bt2, ct2, HW), lambda b, c: (b, c, 0)),
        compiler_params=pltpu.CompilerParams(
            dimension_semantics=("parallel", "parallel"),
            vmem_limit_bytes=limit2),
        cost_estimate=pl.CostEstimate(flops=B * C * HW, transcendentals=0,
                                      bytes_accessed=2 * x_hbm_bytes),
    )(gate3, x3)
    return out3.reshape(B, C, H, W)


# --------------------------------------------------------------------------- #
# reference + self-test
# --------------------------------------------------------------------------- #

def baa_block_ref(x_nchw, w1, w2, gamma, beta):
    """Pure-JAX reference mirroring the PyTorch forward (training-mode BN)."""
    xf = x_nchw.astype(jnp.float32)
    y = jnp.mean(xf, axis=(2, 3))                      # global average pool
    s = _gate_math(y, w1.astype(jnp.float32), w2.astype(jnp.float32),
                   gamma.astype(jnp.float32), beta.astype(jnp.float32))
    return (xf * s[:, :, None, None]).astype(x_nchw.dtype)


if __name__ == "__main__":
    B, C, H, W = 2, 8, 16, 16
    reduction = 4
    C_red = C // reduction

    key = jax.random.PRNGKey(0)
    kx, k1, k2, k3, k4 = jax.random.split(key, 5)
    x = jax.random.normal(kx, (B, C, H, W), dtype=jnp.float32)
    w1 = jax.random.normal(k1, (C_red, C), dtype=jnp.float32) * 0.3   # fc1.weight
    w2 = jax.random.normal(k2, (C, C_red), dtype=jnp.float32) * 0.3   # fc2.weight
    gamma = 1.0 + 0.1 * jax.random.normal(k3, (C,), dtype=jnp.float32)  # bn.weight
    beta = 0.1 * jax.random.normal(k4, (C,), dtype=jnp.float32)         # bn.bias

    ref = jax.block_until_ready(baa_block_ref(x, w1, w2, gamma, beta))

    # Fused fast path (x cached in VMEM, 2x HBM traffic).
    out_fused = jax.block_until_ready(baa_block(x, w1, w2, gamma, beta))
    np.testing.assert_allclose(np.asarray(out_fused), np.asarray(ref),
                               rtol=2e-3, atol=2e-3)

    # Two-pass fallback path (used when x does not fit in VMEM).
    out_two_pass = jax.block_until_ready(
        baa_block(x, w1, w2, gamma, beta, force_two_pass=True))
    np.testing.assert_allclose(np.asarray(out_two_pass), np.asarray(ref),
                               rtol=2e-3, atol=2e-3)

    print("KERNEL_OK")
</pallas_src>

<mosaic_0001>
module attributes {stable_mosaic.version = 11 : i64} {
  func.func @_fused_kernel(%arg0: i32, %arg1: i32, %arg2: i32, %arg3: memref<2x8x256xf32, #tpu.memory_space<vmem>>, %arg4: memref<8x2xf32, #tpu.memory_space<vmem>>, %arg5: memref<2x8xf32, #tpu.memory_space<vmem>>, %arg6: memref<1x8xf32, #tpu.memory_space<vmem>>, %arg7: memref<1x8xf32, #tpu.memory_space<vmem>>, %arg8: memref<2x8x256xf32, #tpu.memory_space<vmem>>, %arg9: memref<2x8x256xf32, #tpu.memory_space<vmem>>, %arg10: memref<2x8x1xf32, #tpu.memory_space<vmem>>, %arg11: memref<2x8x1xf32, #tpu.memory_space<vmem>>) attributes {dimension_semantics = [#tpu.dimension_semantics<arbitrary>, #tpu.dimension_semantics<arbitrary>, #tpu.dimension_semantics<arbitrary>], iteration_bounds = array<i64: 2, 1, 1>, scalar_prefetch = 0 : i64, scratch_operands = 3 : i64, tpu.core_type = #tpu.core_type<tc>, window_params = [{transform_indices = @transform_0, window_bounds = array<i64: 2, 8, 256>}, {pipeline_mode = #tpu.pipeline_mode<synchronous>, transform_indices = @transform_1, window_bounds = array<i64: 8, 2>}, {pipeline_mode = #tpu.pipeline_mode<synchronous>, transform_indices = @transform_2, window_bounds = array<i64: 2, 8>}, {pipeline_mode = #tpu.pipeline_mode<synchronous>, transform_indices = @transform_3, window_bounds = array<i64: 1, 8>}, {pipeline_mode = #tpu.pipeline_mode<synchronous>, transform_indices = @transform_4, window_bounds = array<i64: 1, 8>}, {transform_indices = @transform_5, window_bounds = array<i64: 2, 8, 256>}]} {
    %c0_i32 = arith.constant 0 : i32
    %0 = arith.cmpi eq, %arg0, %c0_i32 : i32
    %1 = arith.extui %0 : i1 to i32
    %c0_i32_0 = arith.constant 0 : i32
    %2 = arith.cmpi ne, %1, %c0_i32_0 : i32
    scf.if %2 {
      %c0 = arith.constant 0 : index
      %c0_2 = arith.constant 0 : index
      %c0_3 = arith.constant 0 : index
      %6 = vector.load %arg3[%c0, %c0_2, %c0_3] : memref<2x8x256xf32, #tpu.memory_space<vmem>>, vector<2x8x256xf32>
      %c0_4 = arith.constant 0 : index
      %c0_5 = arith.constant 0 : index
      %c0_6 = arith.constant 0 : index
      %7 = vector.load %arg9[%c0_4, %c0_5, %c0_6] : memref<2x8x256xf32, #tpu.memory_space<vmem>>, vector<2x8x256xf32>
      tpu.vector_store %arg9[%c0_4, %c0_5, %c0_6], %6 {strides = array<i32>} : memref<2x8x256xf32, #tpu.memory_space<vmem>>, vector<2x8x256xf32>,
      %cst = arith.constant dense<0.000000e+00> : vector<2x8xf32>
      %8 = vector.multi_reduction <add>, %6, %cst [2] : vector<2x8x256xf32> to vector<2x8xf32>
      %9 = vector.shape_cast %8 : vector<2x8xf32> to vector<2x8x1xf32>
      %c0_7 = arith.constant 0 : index
      %c0_8 = arith.constant 0 : index
      %c0_9 = arith.constant 0 : index
      %10 = vector.load %arg10[%c0_7, %c0_8, %c0_9] : memref<2x8x1xf32, #tpu.memory_space<vmem>>, vector<2x8x1xf32>
      tpu.vector_store %arg10[%c0_7, %c0_8, %c0_9], %9 {strides = array<i32>} : memref<2x8x1xf32, #tpu.memory_space<vmem>>, vector<2x8x1xf32>,
    } else {
    }
    %c1_i32 = arith.constant 1 : i32
    %3 = arith.cmpi eq, %arg0, %c1_i32 : i32
    %4 = arith.extui %3 : i1 to i32
    %c0_i32_1 = arith.constant 0 : i32
    %5 = arith.cmpi ne, %4, %c0_i32_1 : i32
    scf.if %5 {
      %c0_i32_2 = arith.constant 0 : i32
      %6 = arith.cmpi eq, %arg1, %c0_i32_2 : i32
      %c0_i32_3 = arith.constant 0 : i32
      %7 = arith.cmpi eq, %arg2, %c0_i32_3 : i32
      %8 = arith.andi %6, %7 : i1
      %9 = arith.extui %8 : i1 to i32
      %c0_i32_4 = arith.constant 0 : i32
      %10 = arith.cmpi ne, %9, %c0_i32_4 : i32
      scf.if %10 {
        %c0_13 = arith.constant 0 : index
        %c0_14 = arith.constant 0 : index
        %c0_15 = arith.constant 0 : index
        %16 = vector.load %arg10[%c0_13, %c0_14, %c0_15] : memref<2x8x1xf32, #tpu.memory_space<vmem>>, vector<2x8x1xf32>
        %17 = vector.shape_cast %16 : vector<2x8x1xf32> to vector<2x8xf32>
        %cst = arith.constant 3.906250e-03 : f32
        %18 = vector.broadcast %cst : f32 to vector<2x8xf32>
        %19 = arith.mulf %17, %18 : vector<2x8xf32>
        %c0_16 = arith.constant 0 : index
        %c0_17 = arith.constant 0 : index
        %20 = vector.load %arg4[%c0_16, %c0_17] : memref<8x2xf32, #tpu.memory_space<vmem>>, vector<8x2xf32>
        %cst_18 = arith.constant dense<0.000000e+00> : vector<2x2xf32>
        %21 = tpu.matmul %19, %20, %cst_18 {dimension_numbers = #tpu.dot_dimension_numbers<[1], [0], [0], [1], [0, 0, 1, 1], [], []>} : vector<2x8xf32>, vector<8x2xf32>, vector<2x2xf32> -> vector<2x2xf32>
        %cst_19 = arith.constant 0.000000e+00 : f32
        %22 = vector.broadcast %cst_19 : f32 to vector<2x2xf32>
        %23 = arith.maximumf %21, %22 : vector<2x2xf32>
        %c0_20 = arith.constant 0 : index
        %c0_21 = arith.constant 0 : index
        %24 = vector.load %arg5[%c0_20, %c0_21] : memref<2x8xf32, #tpu.memory_space<vmem>>, vector<2x8xf32>
        %cst_22 = arith.constant dense<0.000000e+00> : vector<2x8xf32>
        %25 = tpu.matmul %23, %24, %cst_22 {dimension_numbers = #tpu.dot_dimension_numbers<[1], [0], [0], [1], [0, 0, 1, 1], [], []>} : vector<2x2xf32>, vector<2x8xf32>, vector<2x8xf32> -> vector<2x8xf32>
        %cst_23 = arith.constant dense<0.000000e+00> : vector<8xf32>
        %26 = vector.multi_reduction <add>, %25, %cst_23 [0] : vector<2x8xf32> to vector<8xf32>
        %27 = vector.shape_cast %26 : vector<8xf32> to vector<1x8xf32>
        %cst_24 = arith.constant 2.000000e+00 : f32
        %28 = vector.broadcast %cst_24 : f32 to vector<1x8xf32>
        %29 = arith.divf %27, %28 : vector<1x8xf32>
        %30 = vector.broadcast %29 : vector<1x8xf32> to vector<2x8xf32>
        %31 = arith.subf %25, %30 : vector<2x8xf32>
        %32 = arith.mulf %31, %31 : vector<2x8xf32>
        %cst_25 = arith.constant dense<0.000000e+00> : vector<8xf32>
        %33 = vector.multi_reduction <add>, %32, %cst_25 [0] : vector<2x8xf32> to vector<8xf32>
        %34 = vector.shape_cast %33 : vector<8xf32> to vector<1x8xf32>
        %cst_26 = arith.constant 2.000000e+00 : f32
        %35 = vector.broadcast %cst_26 : f32 to vector<1x8xf32>
        %36 = arith.divf %34, %35 : vector<1x8xf32>
        %37 = vector.broadcast %29 : vector<1x8xf32> to vector<2x8xf32>
        %38 = arith.subf %25, %37 : vector<2x8xf32>
        %cst_27 = arith.constant 9.99999974E-6 : f32
        %39 = vector.broadcast %cst_27 : f32 to vector<1x8xf32>
        %40 = arith.addf %36, %39 : vector<1x8xf32>
        %41 = math.rsqrt %40 : vector<1x8xf32>
        %42 = vector.broadcast %41 : vector<1x8xf32> to vector<2x8xf32>
        %43 = arith.mulf %38, %42 : vector<2x8xf32>
        %c0_28 = arith.constant 0 : index
        %c0_29 = arith.constant 0 : index
        %44 = vector.load %arg6[%c0_28, %c0_29] : memref<1x8xf32, #tpu.memory_space<vmem>>, vector<1x8xf32>
        %45 = vector.broadcast %44 : vector<1x8xf32> to vector<2x8xf32>
        %46 = arith.mulf %43, %45 : vector<2x8xf32>
        %c0_30 = arith.constant 0 : index
        %c0_31 = arith.constant 0 : index
        %47 = vector.load %arg7[%c0_30, %c0_31] : memref<1x8xf32, #tpu.memory_space<vmem>>, vector<1x8xf32>
        %48 = vector.broadcast %47 : vector<1x8xf32> to vector<2x8xf32>
        %49 = arith.addf %46, %48 : vector<2x8xf32>
        %50 = arith.negf %49 : vector<2x8xf32>
        %51 = math.exp %50 : vector<2x8xf32>
        %cst_32 = arith.constant 1.000000e+00 : f32
        %52 = vector.broadcast %cst_32 : f32 to vector<2x8xf32>
        %53 = arith.addf %52, %51 : vector<2x8xf32>
        %54 = arith.divf %52, %53 : vector<2x8xf32>
        %55 = vector.shape_cast %54 : vector<2x8xf32> to vector<2x8x1xf32>
        %c0_33 = arith.constant 0 : index
        %c0_34 = arith.constant 0 : index
        %c0_35 = arith.constant 0 : index
        %56 = vector.load %arg11[%c0_33, %c0_34, %c0_35] : memref<2x8x1xf32, #tpu.memory_space<vmem>>, vector<2x8x1xf32>
        tpu.vector_store %arg11[%c0_33, %c0_34, %c0_35], %55 {strides = array<i32>} : memref<2x8x1xf32, #tpu.memory_space<vmem>>, vector<2x8x1xf32>,
      } else {
      }
      %c0 = arith.constant 0 : index
      %c0_5 = arith.constant 0 : index
      %c0_6 = arith.constant 0 : index
      %11 = vector.load %arg9[%c0, %c0_5, %c0_6] : memref<2x8x256xf32, #tpu.memory_space<vmem>>, vector<2x8x256xf32>
      %c0_7 = arith.constant 0 : index
      %c0_8 = arith.constant 0 : index
      %c0_9 = arith.constant 0 : index
      %12 = vector.load %arg11[%c0_7, %c0_8, %c0_9] : memref<2x8x1xf32, #tpu.memory_space<vmem>>, vector<2x8x1xf32>
      %13 = vector.broadcast %12 : vector<2x8x1xf32> to vector<2x8x256xf32>
      %14 = arith.mulf %11, %13 : vector<2x8x256xf32>
      %c0_10 = arith.constant 0 : index
      %c0_11 = arith.constant 0 : index
      %c0_12 = arith.constant 0 : index
      %15 = vector.load %arg8[%c0_10, %c0_11, %c0_12] : memref<2x8x256xf32, #tpu.memory_space<vmem>>, vector<2x8x256xf32>
      tpu.vector_store %arg8[%c0_10, %c0_11, %c0_12], %14 {strides = array<i32>} : memref<2x8x256xf32, #tpu.memory_space<vmem>>, vector<2x8x256xf32>,
    } else {
    }
    return
  }
  func.func @transform_0(%arg0: i32, %arg1: i32, %arg2: i32) -> (i32, i32, i32) {
    %c0_i32 = arith.constant 0 : i32
    %0 = arith.subi %c0_i32, %arg1 : i32
    %1 = arith.muli %arg0, %0 : i32
    %2 = arith.addi %arg1, %1 : i32
    %c0_i32_0 = arith.constant 0 : i32
    %3 = arith.subi %c0_i32_0, %arg2 : i32
    %4 = arith.muli %arg0, %3 : i32
    %5 = arith.addi %arg2, %4 : i32
    %c0_i32_1 = arith.constant 0 : i32
    %c0_i32_2 = arith.constant 0 : i32
    return %2, %5, %c0_i32_1 : i32, i32, i32
  }
  func.func @transform_1(%arg0: i32, %arg1: i32, %arg2: i32) -> (i32, i32) {
    %c0_i32 = arith.constant 0 : i32
    %c0_i32_0 = arith.constant 0 : i32
    %c0_i32_1 = arith.constant 0 : i32
    return %c0_i32, %c0_i32_0 : i32, i32
  }
  func.func @transform_2(%arg0: i32, %arg1: i32, %arg2: i32) -> (i32, i32) {
    %c0_i32 = arith.constant 0 : i32
    %c0_i32_0 = arith.constant 0 : i32
    %c0_i32_1 = arith.constant 0 : i32
    return %c0_i32, %c0_i32_0 : i32, i32
  }
  func.func @transform_3(%arg0: i32, %arg1: i32, %arg2: i32) -> (i32, i32) {
    %c0_i32 = arith.constant 0 : i32
    %c0_i32_0 = arith.constant 0 : i32
    %c0_i32_1 = arith.constant 0 : i32
    return %c0_i32, %c0_i32_0 : i32, i32
  }
  func.func @transform_4(%arg0: i32, %arg1: i32, %arg2: i32) -> (i32, i32) {
    %c0_i32 = arith.constant 0 : i32
    %c0_i32_0 = arith.constant 0 : i32
    %c0_i32_1 = arith.constant 0 : i32
    return %c0_i32, %c0_i32_0 : i32, i32
  }
  func.func @transform_5(%arg0: i32, %arg1: i32, %arg2: i32) -> (i32, i32, i32) {
    %0 = arith.muli %arg1, %arg0 : i32
    %1 = arith.muli %arg2, %arg0 : i32
    %c0_i32 = arith.constant 0 : i32
    %c0_i32_0 = arith.constant 0 : i32
    return %0, %1, %c0_i32 : i32, i32, i32
  }
}

</mosaic_0001>

<bundles_post_ra>
// kernel: tpu_custom_call.1
= control target key start
LH: loop header
LB: loop body
LE: loop exit
PB: predicated region body
PF: predicated region fallthrough
CT: control target
= control target key end

     0   :  { %10 = vsyncpa [#allocation6], 0  ;;  %s1028_s0 = inlined_call_operand.hbm [shape: f32[2,8,256], index: 0, kind: input, shape index: {}]   ;;  %s1029_s1 = inlined_call_operand.vmem [shape: f32[8,2], index: 1, kind: input, shape index: {}]   ;;  %s1030_s2 = inlined_call_operand.vmem [shape: f32[2,8], index: 2, kind: input, shape index: {}]   ;;  %s1031_s3 = inlined_call_operand.vmem [shape: f32[1,8], index: 3, kind: input, shape index: {}]   ;;  %s1032_s4 = inlined_call_operand.vmem [shape: f32[1,8], index: 4, kind: input, shape index: {}]   ;;  %s1033_s5 = inlined_call_operand.hbm [shape: f32[2,8,256], index: 5, kind: output, shape index: {}]  }
   0x1   :  { %12 = vsyncpa [#allocation6 + $0x1], 0 }
   0x2   :  { %13 = vsyncpa [#allocation7], 0 }
   0x3   :  { %15 = vsyncpa [#allocation7 + $0x1], 0  ;;  %s928_s18 = smov 0   ;;  %s930_s19 = smov 0  }
   0x4   :  { %s932_s20 = smov 0  }
   0x5 LB: > { %s707_s21 = sadd.s32 4294967295, %s887_s20   ;;  %s708_s22 = sadd.s32 4294967294, %s887_s20   ;;  %s887_s20 = sphi %s932_s20, %s21_s20   ;;  %s883_s19 = sphi %s930_s19, %s1039_s19   ;;  %s879_s18 = sphi %s928_s18, %s1038_s18  }
   0x6   : > { %s40_s23 = sadd.s32 1, %s883_s19  ;;  %p756_p2 = scmp.lt.s32.totalorder %s887_s20, 2 }
   0x7   : > { %p42_p1 = scmp.ge.s32.totalorder %s40_s23, 2  ;;  %p757_p3 = scmp.eq.s32.totalorder %s887_s20, 0 }
   0x8   : > { %s889_s25 = smov [#allocation5]   ;;  %s803_s29 = scalar_lea.hbm %s1028_s0, 512 }
   0x9   : > { %s1041_s23 = smov (%p42_p1, %s40_s23), 0  ;;  %p951_p4 = pnand %p757_p3, %p756_p2 }
   0xa   : > { %s246_s26 = sshll.u32 %s889_s25, 4  ;;  %p804_p6 = scmp.ne.s32.totalorder %s1028_s0, %s803_s29  ;;  %s247_s26 = int_to_ptr.vmem [resolvable:$true] %s246_s26 }
   0xb   : > { %p805_p7 = pneg %p951_p4  ;;  %p810_p10 = scmp.lt.u32.totalorder %s803_s29, %s1028_s0 }
   0xd   : > { %p806_p8 = pnand %p805_p7, %p804_p6 }
   0xf   : > { %p807_p9 = pneg %p806_p8 }
  0x11   : > { %p812_p11 = pnand %p810_p10, %p807_p9 }
  0x13   : > { %815 = shalt.err (!%p812_p11)
}
  0x14   : > { %s816_s9 = scalar_lea.vmem %s247_s26, 512  ;;  %s823_s10 = scalar_lea.vmem %s247_s26, 1024 }
  0x15   : > { %p817_p12 = scmp.ne.s32.totalorder %s247_s26, %s816_s9  ;;  %p824_p2 = scmp.lt.s32.totalorder %s247_s26, %s247_s26 }
  0x16   : > { %p825_p3 = scmp.lt.s32.totalorder %s823_s10, %s816_s9 }
  0x17   : > { %p819_p13 = pnand %p817_p12, %p805_p7 }
  0x18   : > { %p826_p0 = por %p825_p3, %p824_p2 }
  0x19   : > { %p820_p1 = pneg %p819_p13 }
  0x1b   : > { %p827_p5 = pnand %p826_p0, %p820_p1 }
  0x1d   : > { %830 = shalt.err (!%p827_p5)
}
  0x1e   : > { %s890_s11 = smov 256   ;;  %s891_s12 = smov 16  }
  0x1f   : > { %751 = dma.hbm_to_vmem [thread:$0]  (!%p951_p4), %s1028_s0, 512, %s247_s26, [#allocation6], %s890_s11, %s890_s11, %s891_s12  }
  0x20   : > { %p254_p6 = scmp.lt.s32.totalorder %s887_s20, 3  ;;  %p1035_p8 = scmp.ge.s32.totalorder %s887_s20, 1 }
  0x22   : > { %p255_p7 = pnand %p1035_p8, %p254_p6 }
  0x23   : > { %p758_p9 = scmp.eq.s32.totalorder (!%p255_p7), %s707_s21, 0 }
  0x24   : > { %258 = sbr.rel (%p255_p7) target bundleno = 1124 (0x464), region = 40 }
  0x2b   : > { %870 = dma.done.wait (%p758_p9), [#allocation6], 512  }
  0x2c   : > { %872 = vsyncadd (%p758_p9), [#allocation6], 4294966784  ;;  %p714_p0 = scmp.ne.s32.totalorder %s879_s18, 0 }
  0x2d   : > { %v305_v0 = vld [vmem:[#allocation5] sm:$0xff] (!%p714_p0)  ;;  %v306_v1 = vld [vmem:[#allocation5 + $0x8] sm:$0xff] (!%p714_p0)  ;;  %v307_v2 = vld [vmem:[#allocation5 + $0x10] sm:$0xff] (!%p714_p0)  ;;  %vm319_vm0 = vcmask (!%p714_p0), 7168  }
  0x2e   : > { %304 = sbr.rel (%p714_p0) target bundleno = 195 (0xc3), region = 48  ;;  %310 = vst [vmem:[#allocation2 + $0x8] sm:$0xff] (!%p714_p0), %v306_v1  ;;  %v313_v3 = vadd.f32 (!%p714_p0), %v306_v1, %v305_v0  ;;  %309 = vst [vmem:[#allocation2] sm:$0xff] (!%p714_p0), %v305_v0  ;;  %v308_v4 = vld [vmem:[#allocation5 + $0x18] sm:$0xff] (!%p714_p0) }
  0x2f   : > { %311 = vst [vmem:[#allocation2 + $0x10] sm:$0xff] (!%p714_p0), %v307_v2  ;;  %312 = vst [vmem:[#allocation2 + $0x18] sm:$0xff] (!%p714_p0), %v308_v4  ;;  %v316_v5 = vadd.f32 (!%p714_p0), %v308_v4, %v307_v2 }
  0x30   : > { %314 = vadd.xlane.f32.xlu0 (!%p714_p0), %v313_v3 }
  0x34   : > { %317 = vadd.xlane.f32.xlu0 (!%p714_p0), %v316_v5 }
  0xbd   : > { %v315_v6 = vpop.xlane.xlu0 %314 }
  0xbe   : > { %320 = vst.msk [vmem:[#allocation3] sm:$0xff] %vm319_vm0, %v315_v6 }
  0xc1   : > { %v318_v7 = vpop.xlane.xlu0 %317 }
  0xc2   : > { %321 = vst.msk [vmem:[#allocation3 + $0x8] sm:$0xff] %vm319_vm0, %v318_v7 }
  0xc3 PF: > { %p715_p4 = scmp.ne.s32.totalorder %s879_s18, 1 }
  0xc4   : > { %v892_v10 = vmov (!%p715_p4), 0   ;;  %v336_v13 = vld [vmem:[%s1029_s1] sm:$0xff] (!%p715_p4)  ;;  %v893_v14 = vmov (!%p715_p4), 0.0   ;;  %vm894_vm1 = vmmov (!%p715_p4), 0   ;;  %v345_v15 = vlaneseq (!%p715_p4)  ;;  %v573_v4 = vld [vmem:[#allocation2 + $0x8] sm:$0xff] (!%p715_p4) }
  0xc5   : > { %325 = sbr.rel (%p715_p4) target bundleno = 1100 (0x44c), region = 52  ;;  %v332_v8 = vld [vmem:[#allocation3] sm:$0xff] (!%p715_p4)  ;;  %795 = vset.pattern.permute.xlu0 (!%p715_p4), %v892_v10  ;;  %796 = vset.pattern.permute.xlu1 (!%p715_p4), %v892_v10  ;;  %vm355_vm2 = vcmask (!%p715_p4), 1041409   ;;  %vm357_vm3 = vcmask (!%p715_p4), 64512   ;;  %vm436_vm4 = vcmask (!%p715_p4), 1041408   ;;  %vm432_vm5 = vcmask (!%p715_p4), 15360  }
  0xc6   : > { %v334_v11 = vmul.f32 (!%p715_p4), 0.00390625, %v332_v8  ;;  %730 = vmatprep.subr.mxu0 (!%p715_p4), %v893_v14  ;;  %732 = vmatprep.mubr.msk.f32.mxu0 (!%p715_p4), %vm894_vm1, %v893_v14  ;;  %v346_v16 = vand.u32 (!%p715_p4), 127, %v345_v15  ;;  %v348_v17 = vshrl.u32 (!%p715_p4), %v345_v15, 7  ;;  %v431_v24 = vld [vmem:[%s1030_s2] sm:$0x3] (!%p715_p4)  ;;  %vm510_vm6 = vcmask (!%p715_p4), 58368  }
  0xc7   : > { %731 = vmatpush3.msra.mxu0 (!%p715_p4), %v336_v13  ;;  %735 = vmatprep.subr.mxu1 (!%p715_p4), %v893_v14  ;;  %v719_v50 = vld [vmem:[%s1031_s3] ss:$0 sm:$0xff] (!%p715_p4)  ;;  %vm569_vm7 = vcmask (!%p715_p4), 7168   ;;  %v574_v8 = vld [vmem:[#allocation2 + $0x10] sm:$0xff] (!%p715_p4) }
  0xc8   : > { %340 = vperm.xlu0 (!%p715_p4), %795, %v334_v11   ;;  %737 = vmatprep.mubr.msk.f32.mxu1 (!%p715_p4), %vm894_vm1, %v893_v14  ;;  %v349_v19 = vsub.s32 (!%p715_p4), %v346_v16, %v348_v17  ;;  %v720_v52 = vld [vmem:[%s1032_s4] ss:$0 sm:$0xff] (!%p715_p4)  ;;  %v557_v58 = vsub.s32 (!%p715_p4), 0, %v348_v17  ;;  %v564_v61 = vsub.s32 (!%p715_p4), 1, %v348_v17 }
  0xc9   : > { %v333_v9 = vld [vmem:[#allocation3 + $0x8] sm:$0xff] (!%p715_p4)  ;;  %736 = vmatpush3.msk.msra.mxu1 (!%p715_p4), %vm436_vm4, %v431_v24  ;;  %v572_v3 = vld [vmem:[#allocation2] sm:$0xff] (!%p715_p4) }
  0xca   : > { %v335_v12 = vmul.f32 (!%p715_p4), 0.00390625, %v333_v9  ;;  %v575_v9 = vld [vmem:[#allocation2 + $0x18] sm:$0xff] (!%p715_p4) }
  0xcc   : > { %343 = vperm.xlu0 %795, %v335_v12  }
 0x147   : > { %v341_v18 = vpop.permute.xlu0 %340 }
 0x148   : > { %v350_v21 = vrot.slane %v341_v18, %v349_v19 }
 0x14b   : > { %v344_v20 = vpop.permute.xlu0 %343 }
 0x14c   : > { %v354_v22 = vrot.slane %v344_v20, %v349_v19 }
 0x14e   : > { %v356_v23 = vsel %vm355_vm2, %v354_v22, %v350_v21 }
 0x14f   : > { %733 = vmatmul.mubr.msk.f32.vlgmr.msra.gmra.mrb[0].mxu0 %vm357_vm3, %v356_v23 }
 0x222   : > { %v426_v25 = vpop.f32.mrb[0].mxu0 }
 0x223   : > { %v430_v26 = vmax.f32 %v426_v25, 0.0  ;;  %v734_v27 = vpop.f32.mrb[1].mxu0 }
 0x225   : > { %738 = vmatmul.mubr.msk.f32.vlgmr.msra.gmra.mrb[0].mxu1 %vm432_vm5, %v430_v26 }
 0x2f8   : > { %v506_v28 = vpop.f32.mrb[0].mxu1 }
 0x2f9   : > { %v511_v29 = vsel %vm510_vm6, %v506_v28, 0.0  ;;  %v739_v30 = vpop.f32.mrb[1].mxu1 }
 0x2fa   : > { %v512_v31 = vrot.slane %v511_v29, 4 }
 0x2fc   : > { %v513_v32 = vadd.f32 %v512_v31, %v511_v29 }
 0x2fe   : > { %v514_v33 = vrot.slane %v513_v32, 2 }
 0x300   : > { %v515_v34 = vadd.f32 %v514_v33, %v513_v32 }
 0x302   : > { %v516_v35 = vrot.slane %v515_v34, 1 }
 0x304   : > { %v517_v36 = vadd.f32 %v516_v35, %v515_v34 }
 0x306   : > { %v519_v37 = vmul.f32 0.5, %v517_v36 }
 0x308   : > { %v520_v38 = vsub.f32 %v506_v28, %v519_v37 }
 0x30a   : > { %v521_v39 = vmul.f32 %v520_v38, %v520_v38 }
 0x30c   : > { %v522_v40 = vsel %vm510_vm6, %v521_v39, 0.0 }
 0x30d   : > { %v523_v41 = vrot.slane %v522_v40, 4 }
 0x30f   : > { %v524_v42 = vadd.f32 %v523_v41, %v522_v40 }
 0x311   : > { %v525_v43 = vrot.slane %v524_v42, 2 }
 0x313   : > { %v526_v44 = vadd.f32 %v525_v43, %v524_v42 }
 0x315   : > { %v527_v45 = vrot.slane %v526_v44, 1 }
 0x317   : > { %v528_v46 = vadd.f32 %v527_v45, %v526_v44 }
 0x319   : > { %v529_v47 = vmul.f32 0.5, %v528_v46 }
 0x31b   : > { %v530_v48 = vadd.f32 1e-05, %v529_v47 }
 0x31d   : > { %797 = vrsqrt.f32 %v530_v48 }
 0x327   : > { %v798_v49 = vpop.eup %797 }
 0x328   : > { %v532_v51 = vmul.f32 %v798_v49, %v520_v38 }
 0x32a   : > { %v540_v53 = vmul.f32 %v719_v50, %v532_v51 }
 0x32c   : > { %v548_v54 = vadd.f32 %v720_v52, %v540_v53 }
 0x32e   : > { %v721_v55 = vmul.f32 -1.442695, %v548_v54 }
 0x330   : > { %799 = vpow2.f32 %v721_v55 }
 0x33a   : > { %v800_v56 = vpop.eup %799 }
 0x33b   : > { %v552_v57 = vadd.f32 1.0, %v800_v56 }
 0x33d   : > { %801 = vrcp.f32 %v552_v57 }
 0x347   : > { %v802_v59 = vpop.eup %801 }
 0x348   : > { %v558_v60 = vrot.slane %v802_v59, %v557_v58  ;;  %v565_v62 = vrot.slane %v802_v59, %v564_v61 }
 0x34a   : > { %560 = vbcast.lane.b32.xlu1 %v558_v60, 256 }
 0x34e   : > { %567 = vbcast.lane.b32.xlu1 %v565_v62, 256 }
 0x3bc   : > { %v561_v63 = vpop.permute.xlu1 %560 }
 0x3bd   : > { %570 = vst.msk [vmem:[#allocation4] sm:$0xff] %vm569_vm7, %v561_v63 }
 0x3c0   : > { %v568_v0 = vpop.permute.xlu1 %567 }
 0x3c1   : > { %571 = vst.msk [vmem:[#allocation4 + $0x8] sm:$0xff] %vm569_vm7, %v568_v0 }
 0x3c4   : > { %v576_v1 = vld [vmem:[#allocation4] sm:$0xff] }
 0x3c5   : > { %580 = vperm.xlu0 %795, %v576_v1  }
 0x3c8   : > { %v577_v2 = vld [vmem:[#allocation4 + $0x8] sm:$0xff] }
 0x3c9   : > { %585 = vperm.xlu1 %796, %v577_v2  }
 0x444   : > { %v581_v5 = vpop.permute.xlu0 %580 }
 0x445   : > { %v588_v6 = vmul.f32 %v581_v5, %v572_v3  ;;  %v589_v7 = vmul.f32 %v581_v5, %v573_v4 }
 0x447   : > { %592 = vst [vmem:[#allocation8] sm:$0xff] %v588_v6  ;;  %593 = vst [vmem:[#allocation8 + $0x8] sm:$0xff] %v589_v7 }
 0x448   : > { %v586_v10 = vpop.permute.xlu1 %585 }
 0x449   : > { %v590_v11 = vmul.f32 %v586_v10, %v574_v8  ;;  %v591_v12 = vmul.f32 %v586_v10, %v575_v9 }
 0x44b   : > { %594 = vst [vmem:[#allocation8 + $0x10] sm:$0xff] %v590_v11  ;;  %595 = vst [vmem:[#allocation8 + $0x18] sm:$0xff] %v591_v12 }
 0x44c PF: > { %p993_p5 = scmp.eq.s32.totalorder %s707_s21, 1  ;;  %s895_s29 = smov [#allocation8]  }
 0x44d   : > { %s615_s30 = sshll.u32 %s895_s29, 4  ;;  %s616_s30 = int_to_ptr.vmem [resolvable:$true] %s615_s30 }
 0x44e   : > { %s831_s6 = scalar_lea.vmem %s616_s30, 512  ;;  %s837_s7 = scalar_lea.vmem %s616_s30, 1024 }
 0x44f   : > { %p832_p10 = scmp.ne.s32.totalorder %s616_s30, %s831_s6  ;;  %p838_p13 = scmp.lt.s32.totalorder %s616_s30, %s616_s30 }
 0x450   : > { %p839_p1 = scmp.lt.s32.totalorder %s837_s7, %s831_s6 }
 0x451   : > { %p833_p11 = pnand %p832_p10, %p993_p5 }
 0x452   : > { %p840_p2 = por %p839_p1, %p838_p13 }
 0x453   : > { %p834_p12 = pneg %p833_p11 }
 0x455   : > { %p841_p3 = pnand %p840_p2, %p834_p12 }
 0x457   : > { %844 = shalt.err (!%p841_p3)
}
 0x458   : > { %s845_s9 = scalar_lea.hbm %s1033_s5, 512 }
 0x459   : > { %p846_p6 = scmp.ne.s32.totalorder %s1033_s5, %s845_s9  ;;  %p851_p9 = scmp.lt.u32.totalorder %s845_s9, %s1033_s5 }
 0x45b   : > { %p847_p8 = pnand %p846_p6, %p993_p5 }
 0x45d   : > { %p848_p7 = pneg %p847_p8 }
 0x45f   : > { %p853_p0 = pnand %p851_p9, %p848_p7 }
 0x461   : > { %856 = shalt.err (!%p853_p0)
}
 0x462   : > { %s896_s14 = smov 256   ;;  %s897_s15 = smov 16  }
 0x463   : > { %745 = dma.vmem_to_hbm [thread:$0]  (%p993_p5), %s616_s30, 512, %s1033_s5, [#allocation7], %s896_s14, %s896_s14, %s897_s15  }
 0x464 PF: > { %p761_p4 = scmp.eq.s32.totalorder %s708_s22, 1  ;;  %p1037_p10 = scmp.ge.s32.totalorder %s887_s20, 2 }
 0x466   : > { %p753_p11 = pnand %p761_p4, %p1037_p10 }
 0x468   : > { %874 = dma.done.wait (!%p753_p11), [#allocation7], 512  }
 0x469   : > { %876 = vsyncadd (!%p753_p11), [#allocation7], 4294966784  ;;  %s21_s20 = sadd.s32 1, %s887_s20   ;;  %s1038_s18 = smov %s883_s19 }
 0x46a   : > { %p18_p12 = scmp.ge.s32.totalorder %s21_s20, 4   ;;  %s1039_s19 = smov %s1041_s23 }
 0x46c   :  { %20 = sbr.rel (!%p18_p12) target bundleno = 5 (0x5), region = 97 }
 0x473   :  { %636 = vsyncpa [#allocation6], 1 }
 0x474   :  { %638 = vsyncpa [#allocation6 + $0x1], 1 }
 0x475   :  { %639 = vsyncpa [#allocation7], 1 }
 0x476   :  { %641 = vsyncpa [#allocation7 + $0x1], 1 }

</bundles_post_ra>
